<compile_context>
chip_gen: v5e
topology: v5e:2x2
jax: 0.10.0
libtpu: 0.0.40
codegen_flags: <defaults>
</compile_context>

<pallas_src>
import jax
import jax.numpy as jnp
from jax.experimental import pallas as pl
from jax.experimental.pallas import tpu as pltpu


def _round_up(x: int, m: int) -> int:
    return (x + m - 1) // m * m


def _vmem_capacity_bytes() -> int:
    try:
        return int(pltpu.get_tpu_info().vmem_capacity_bytes)
    except Exception:
        return 64 << 20  # conservative fallback: v7x per-TensorCore VMEM


def _vmem_need_bytes(block_b, block_k, Hp, Cp, cbytes, obytes):
    """Rough double-buffered VMEM footprint for one grid step."""
    x_buf = 2 * block_b * block_k * cbytes
    w1_buf = 2 * block_k * Hp * cbytes
    w2_buf = 2 * Hp * Cp * cbytes           # could be halved with pl.Buffered(1)
    bias_buf = 2 * 8 * (Hp + Cp) * 4
    o_buf = 2 * block_b * Cp * obytes
    work = 2 * block_b * Hp * 4              # f32 accumulator / tanh intermediates
    return x_buf + w1_buf + w2_buf + bias_buf + o_buf + work


# --------------------------------------------------------------------------- #
# Kernels
# --------------------------------------------------------------------------- #
def _mlp_head_fused_kernel(x_ref, w1_ref, b1_ref, w2_ref, b2_ref, o_ref):
    """Single-K-step fast path: no VMEM accumulator round trips."""
    h = jnp.tanh(jnp.dot(x_ref[...], w1_ref[...],
                         preferred_element_type=jnp.float32) + b1_ref[...])
    out = jnp.dot(h.astype(w2_ref.dtype), w2_ref[...],
                  preferred_element_type=jnp.float32) + b2_ref[...]
    o_ref[...] = out.astype(o_ref.dtype)


def _mlp_head_ktiled_kernel(x_ref, w1_ref, b1_ref, w2_ref, b2_ref, o_ref,
                            acc_ref):
    """grid = (batch tiles [parallel], input_dim K tiles [arbitrary])."""
    k = pl.program_id(1)

    @pl.when(k == 0)
    def _init():
        acc_ref[...] = jnp.zeros_like(acc_ref)

    acc_ref[...] += jnp.dot(x_ref[...], w1_ref[...],
                            preferred_element_type=jnp.float32)

    @pl.when(k == pl.num_programs(1) - 1)
    def _finalize():
        # Bias add + tanh + tiny out_proj only once per batch tile.
        h = jnp.tanh(acc_ref[...] + b1_ref[...])
        out = jnp.dot(h.astype(w2_ref.dtype), w2_ref[...],
                      preferred_element_type=jnp.float32) + b2_ref[...]
        o_ref[...] = out.astype(o_ref.dtype)


# --------------------------------------------------------------------------- #
# Setup (once) + apply (per call)
# --------------------------------------------------------------------------- #
def prepare_mlp_head_params(w1, b1, w2, b2, *, compute_dtype=jnp.bfloat16):
    """Pad/cast the weights ONCE (call at model setup, not per forward pass).

    w1: (D, H); b1: (H,); w2: (H, C); b2: (C,)
    (These are the transposes of PyTorch nn.Linear's (out, in) weight layout.)
    """
    D, H = w1.shape
    Hw2, C = w2.shape
    assert Hw2 == H, (Hw2, H)
    wdt = jnp.dtype(compute_dtype) if compute_dtype is not None else jnp.dtype(w1.dtype)
    Dp, Hp, Cp = _round_up(D, 128), _round_up(H, 128), _round_up(C, 128)
    # Zero padding is exact for the valid [:B, :C] region.
    w1p = jnp.pad(w1, ((0, Dp - D), (0, Hp - H))).astype(wdt)
    w2p = jnp.pad(w2, ((0, Hp - H), (0, Cp - C))).astype(wdt)
    # Biases stay f32: they are added to the f32 accumulator.
    b1p = jnp.pad(b1.astype(jnp.float32), (0, Hp - H)).reshape(1, Hp)
    b2p = jnp.pad(b2.astype(jnp.float32), (0, Cp - C)).reshape(1, Cp)
    return dict(w1=w1p, b1=b1p, w2=w2p, b2=b2p,
                D=D, H=H, C=C, Dp=Dp, Hp=Hp, Cp=Cp, compute_dtype=wdt)


def _select_tiles(B, Dp_full, Hp, Cp, cbytes, obytes, block_b, block_k, budget):
    # Batch tile: minimize padding; prefer >=2 tiles (dual-TC) on ties.
    if block_b is None:
        if B <= 128:
            block_b = _round_up(max(B, 8), 8)
        else:
            best = None
            for bb in (128, 256, 512):
                Bp = _round_up(B, bb)
                n_tiles = Bp // bb
                key = (Bp, 0 if n_tiles >= 2 else 1, -bb)
                if best is None or key < best[0]:
                    best = (key, bb)
            block_b = best[1]
    else:
        block_b = _round_up(block_b, 8)

    # K tile: largest 128-multiple divisor of padded D that fits the budget
    # (full D if possible -> fused fast path, no accumulator).
    if block_k is None:
        n = Dp_full // 128
        block_k = 128
        for d in sorted((d for d in range(1, n + 1) if n % d == 0), reverse=True):
            bk = d * 128
            if _vmem_need_bytes(block_b, bk, Hp, Cp, cbytes, obytes) <= budget:
                block_k = bk
                break
    else:
        block_k = min(_round_up(block_k, 128), Dp_full)

    # If even the smallest K tile is over budget, shrink the batch tile.
    while (_vmem_need_bytes(block_b, block_k, Hp, Cp, cbytes, obytes) > budget
           and block_b > 128):
        block_b = max(128, block_b // 2)

    return block_b, block_k


def mlp_head_apply(x, params, *, block_b=None, block_k=None, out_dtype=None):
    """x: (B, D) -> logits (B, C), using weights prepared by prepare_mlp_head_params."""
    B, D = x.shape
    assert D == params["D"], (D, params["D"])
    Dp0, Hp, Cp = params["Dp"], params["Hp"], params["Cp"]
    cdt = params["compute_dtype"]
    out_dtype = jnp.dtype(out_dtype) if out_dtype is not None else jnp.dtype(x.dtype)
    cbytes = jnp.dtype(cdt).itemsize
    obytes = out_dtype.itemsize

    cap = _vmem_capacity_bytes()
    budget = int(cap * 0.6)                      # headroom for Mosaic scratch
    block_b, block_k = _select_tiles(B, Dp0, Hp, Cp, cbytes, obytes,
                                     block_b, block_k, budget)

    Bp = _round_up(B, block_b)
    Dp = _round_up(Dp0, block_k)

    xp = x.astype(cdt) if x.dtype != cdt else x
    if (Bp, Dp) != (B, D):
        xp = jnp.pad(xp, ((0, Bp - B), (0, Dp - D)))

    w1p, b1p, w2p, b2p = params["w1"], params["b1"], params["w2"], params["b2"]
    if Dp != Dp0:
        # Only reachable when a caller-forced block_k does not divide the
        # prepared Dp; the auto-chosen block_k always divides it.
        w1p = jnp.pad(w1p, ((0, Dp - Dp0), (0, 0)))

    n_b = Bp // block_b
    n_k = Dp // block_k

    vmem_limit = int(min(cap * 0.9,
                         max(_vmem_need_bytes(block_b, block_k, Hp, Cp,
                                              cbytes, obytes) + (8 << 20),
                             32 << 20)))

    cost = pl.CostEstimate(
        flops=2 * Bp * (Dp * Hp + Hp * Cp),
        transcendentals=Bp * Hp,  # tanh
        bytes_accessed=(xp.size * cbytes
                        + n_b * (w1p.size + w2p.size) * cbytes
                        + (b1p.size + b2p.size) * 4
                        + Bp * Cp * obytes),
    )

    if n_k == 1:
        out = pl.pallas_call(
            _mlp_head_fused_kernel,
            out_shape=jax.ShapeDtypeStruct((Bp, Cp), out_dtype),
            grid_spec=pltpu.PrefetchScalarGridSpec(
                num_scalar_prefetch=0,
                grid=(n_b,),
                in_specs=[
                    pl.BlockSpec((block_b, Dp), lambda i: (i, 0)),   # x tile
                    pl.BlockSpec((Dp, Hp), lambda i: (0, 0)),        # W1 (resident)
                    pl.BlockSpec((1, Hp), lambda i: (0, 0)),         # b1 (f32)
                    pl.BlockSpec((Hp, Cp), lambda i: (0, 0)),        # W2
                    pl.BlockSpec((1, Cp), lambda i: (0, 0)),         # b2 (f32)
                ],
                out_specs=pl.BlockSpec((block_b, Cp), lambda i: (i, 0)),
            ),
            compiler_params=pltpu.CompilerParams(
                dimension_semantics=("parallel",),
                vmem_limit_bytes=vmem_limit),
            cost_estimate=cost,
        )(xp, w1p, b1p, w2p, b2p)
    else:
        out = pl.pallas_call(
            _mlp_head_ktiled_kernel,
            out_shape=jax.ShapeDtypeStruct((Bp, Cp), out_dtype),
            grid_spec=pltpu.PrefetchScalarGridSpec(
                num_scalar_prefetch=0,
                grid=(n_b, n_k),
                in_specs=[
                    pl.BlockSpec((block_b, block_k), lambda i, k: (i, k)),  # x tile
                    pl.BlockSpec((block_k, Hp), lambda i, k: (k, 0)),       # W1 K-tile
                    pl.BlockSpec((1, Hp), lambda i, k: (0, 0)),             # b1 (f32)
                    pl.BlockSpec((Hp, Cp), lambda i, k: (0, 0)),            # W2
                    pl.BlockSpec((1, Cp), lambda i, k: (0, 0)),             # b2 (f32)
                ],
                out_specs=pl.BlockSpec((block_b, Cp), lambda i, k: (i, 0)),
                scratch_shapes=[pltpu.VMEM((block_b, Hp), jnp.float32)],
            ),
            compiler_params=pltpu.CompilerParams(
                dimension_semantics=("parallel", "arbitrary"),
                vmem_limit_bytes=vmem_limit),
            cost_estimate=cost,
        )(xp, w1p, b1p, w2p, b2p)

    return out[:B, :params["C"]]


def mlp_head(x, w1, b1, w2, b2, *, compute_dtype=jnp.bfloat16,
             block_b=None, block_k=None):
    """One-shot convenience wrapper.

    For repeated calls, use prepare_mlp_head_params(...) once and
    mlp_head_apply(...) per call so the weights are not re-padded/re-cast
    (a full W1 HBM pass) on every invocation.
    """
    params = prepare_mlp_head_params(w1, b1, w2, b2, compute_dtype=compute_dtype)
    return mlp_head_apply(x, params, block_b=block_b, block_k=block_k)


def mlp_head_ref(x, w1, b1, w2, b2, compute_dtype=None):
    """Pure-JAX reference matching the kernel's dtype policy."""
    if compute_dtype is not None:
        x = x.astype(compute_dtype)
        w1 = w1.astype(compute_dtype)
        w2 = w2.astype(compute_dtype)
    h = jnp.tanh(jnp.dot(x, w1, preferred_element_type=jnp.float32)
                 + b1.astype(jnp.float32))
    out = jnp.dot(h.astype(w2.dtype), w2,
                  preferred_element_type=jnp.float32) + b2.astype(jnp.float32)
    return out


if __name__ == "__main__":
    def make_params(key, D, H, C, zero_bias=True):
        kw1, kw2, kb1, kb2 = jax.random.split(key, 4)
        # PyTorch Linear weight is (out, in); we store the transpose (in, out).
        # _init_weights: weight ~ N(0, 1), bias = 0 (nonzero option for testing).
        w1 = jax.random.normal(kw1, (D, H), dtype=jnp.float32)
        w2 = jax.random.normal(kw2, (H, C), dtype=jnp.float32)
        if zero_bias:
            b1 = jnp.zeros((H,), dtype=jnp.float32)
            b2 = jnp.zeros((C,), dtype=jnp.float32)
        else:
            b1 = jax.random.normal(kb1, (H,), dtype=jnp.float32)
            b2 = jax.random.normal(kb2, (C,), dtype=jnp.float32)
        return w1, b1, w2, b2

    # Test 1: small shapes, f32 compute (opt-out of bf16), fused fast path.
    B, D, H, C = 8, 32, 32, 8
    kx, kp = jax.random.split(jax.random.PRNGKey(0))
    x = jax.random.normal(kx, (B, D), dtype=jnp.float32)
    w1, b1, w2, b2 = make_params(kp, D, H, C, zero_bias=True)
    out = jax.block_until_ready(
        mlp_head(x, w1, b1, w2, b2, compute_dtype=jnp.float32))
    ref = mlp_head_ref(x, w1, b1, w2, b2)
    assert out.shape == (B, C)
    assert jnp.allclose(out, ref, atol=1e-4, rtol=1e-4)

    # Test 2: unaligned shapes, default bf16 compute, forced block_k=128 to
    # exercise the K-tiled accumulator path (3 batch tiles x 3 K tiles),
    # H/C zero-padding and nonzero biases.
    B, D, H, C = 300, 300, 200, 7
    kx, kp = jax.random.split(jax.random.PRNGKey(1))
    x = jax.random.normal(kx, (B, D), dtype=jnp.float32)
    w1, b1, w2, b2 = make_params(kp, D, H, C, zero_bias=False)
    out = jax.block_until_ready(mlp_head(x, w1, b1, w2, b2, block_k=128))
    ref = mlp_head_ref(x, w1, b1, w2, b2, compute_dtype=jnp.bfloat16)
    assert out.shape == (B, C)
    assert jnp.allclose(out, ref, atol=2e-2, rtol=2e-2)

    # Test 3: production path — prepare once, apply with auto tiles
    # (fused fast path, weights already padded/cast to bf16).
    params = prepare_mlp_head_params(w1, b1, w2, b2)
    out = jax.block_until_ready(mlp_head_apply(x, params))
    assert out.shape == (B, C)
    assert jnp.allclose(out, ref, atol=2e-2, rtol=2e-2)

    print("KERNEL_OK")
</pallas_src>

<mosaic_0001>
module attributes {stable_mosaic.version = 11 : i64} {
  func.func @_mlp_head_fused_kernel(%arg0: i32, %arg1: memref<8x128xf32, #tpu.memory_space<vmem>>, %arg2: memref<128x128xf32, #tpu.memory_space<vmem>>, %arg3: memref<1x128xf32, #tpu.memory_space<vmem>>, %arg4: memref<128x128xf32, #tpu.memory_space<vmem>>, %arg5: memref<1x128xf32, #tpu.memory_space<vmem>>, %arg6: memref<8x128xf32, #tpu.memory_space<vmem>>) attributes {dimension_semantics = [#tpu.dimension_semantics<parallel>], iteration_bounds = array<i64: 1>, scalar_prefetch = 0 : i64, scratch_operands = 0 : i64, tpu.core_type = #tpu.core_type<tc>, window_params = [{transform_indices = @transform_0, window_bounds = array<i64: 8, 128>}, {pipeline_mode = #tpu.pipeline_mode<synchronous>, transform_indices = @transform_1, window_bounds = array<i64: 128, 128>}, {pipeline_mode = #tpu.pipeline_mode<synchronous>, transform_indices = @transform_2, window_bounds = array<i64: 1, 128>}, {pipeline_mode = #tpu.pipeline_mode<synchronous>, transform_indices = @transform_3, window_bounds = array<i64: 128, 128>}, {pipeline_mode = #tpu.pipeline_mode<synchronous>, transform_indices = @transform_4, window_bounds = array<i64: 1, 128>}, {transform_indices = @transform_5, window_bounds = array<i64: 8, 128>}]} {
    %c0 = arith.constant 0 : index
    %c0_0 = arith.constant 0 : index
    %0 = vector.load %arg1[%c0, %c0_0] : memref<8x128xf32, #tpu.memory_space<vmem>>, vector<8x128xf32>
    %c0_1 = arith.constant 0 : index
    %c0_2 = arith.constant 0 : index
    %1 = vector.load %arg2[%c0_1, %c0_2] : memref<128x128xf32, #tpu.memory_space<vmem>>, vector<128x128xf32>
    %cst = arith.constant dense<0.000000e+00> : vector<8x128xf32>
    %2 = tpu.matmul %0, %1, %cst {dimension_numbers = #tpu.dot_dimension_numbers<[1], [0], [0], [1], [0, 0, 1, 1], [], []>} : vector<8x128xf32>, vector<128x128xf32>, vector<8x128xf32> -> vector<8x128xf32>
    %c0_3 = arith.constant 0 : index
    %c0_4 = arith.constant 0 : index
    %3 = vector.load %arg3[%c0_3, %c0_4] : memref<1x128xf32, #tpu.memory_space<vmem>>, vector<1x128xf32>
    %4 = vector.broadcast %3 : vector<1x128xf32> to vector<8x128xf32>
    %5 = arith.addf %2, %4 : vector<8x128xf32>
    %6 = math.tanh %5 : vector<8x128xf32>
    %c0_5 = arith.constant 0 : index
    %c0_6 = arith.constant 0 : index
    %7 = vector.load %arg4[%c0_5, %c0_6] : memref<128x128xf32, #tpu.memory_space<vmem>>, vector<128x128xf32>
    %cst_7 = arith.constant dense<0.000000e+00> : vector<8x128xf32>
    %8 = tpu.matmul %6, %7, %cst_7 {dimension_numbers = #tpu.dot_dimension_numbers<[1], [0], [0], [1], [0, 0, 1, 1], [], []>} : vector<8x128xf32>, vector<128x128xf32>, vector<8x128xf32> -> vector<8x128xf32>
    %c0_8 = arith.constant 0 : index
    %c0_9 = arith.constant 0 : index
    %9 = vector.load %arg5[%c0_8, %c0_9] : memref<1x128xf32, #tpu.memory_space<vmem>>, vector<1x128xf32>
    %10 = vector.broadcast %9 : vector<1x128xf32> to vector<8x128xf32>
    %11 = arith.addf %8, %10 : vector<8x128xf32>
    %c0_10 = arith.constant 0 : index
    %c0_11 = arith.constant 0 : index
    %12 = vector.load %arg6[%c0_10, %c0_11] : memref<8x128xf32, #tpu.memory_space<vmem>>, vector<8x128xf32>
    tpu.vector_store %arg6[%c0_10, %c0_11], %11 {strides = array<i32>} : memref<8x128xf32, #tpu.memory_space<vmem>>, vector<8x128xf32>,
    return
  }
  func.func @transform_0(%arg0: i32) -> (i32, i32) {
    %c0_i32 = arith.constant 0 : i32
    %c0_i32_0 = arith.constant 0 : i32
    return %arg0, %c0_i32 : i32, i32
  }
  func.func @transform_1(%arg0: i32) -> (i32, i32) {
    %c0_i32 = arith.constant 0 : i32
    %c0_i32_0 = arith.constant 0 : i32
    %c0_i32_1 = arith.constant 0 : i32
    return %c0_i32, %c0_i32_0 : i32, i32
  }
  func.func @transform_2(%arg0: i32) -> (i32, i32) {
    %c0_i32 = arith.constant 0 : i32
    %c0_i32_0 = arith.constant 0 : i32
    %c0_i32_1 = arith.constant 0 : i32
    return %c0_i32, %c0_i32_0 : i32, i32
  }
  func.func @transform_3(%arg0: i32) -> (i32, i32) {
    %c0_i32 = arith.constant 0 : i32
    %c0_i32_0 = arith.constant 0 : i32
    %c0_i32_1 = arith.constant 0 : i32
    return %c0_i32, %c0_i32_0 : i32, i32
  }
  func.func @transform_4(%arg0: i32) -> (i32, i32) {
    %c0_i32 = arith.constant 0 : i32
    %c0_i32_0 = arith.constant 0 : i32
    %c0_i32_1 = arith.constant 0 : i32
    return %c0_i32, %c0_i32_0 : i32, i32
  }
  func.func @transform_5(%arg0: i32) -> (i32, i32) {
    %c0_i32 = arith.constant 0 : i32
    %c0_i32_0 = arith.constant 0 : i32
    return %arg0, %c0_i32 : i32, i32
  }
}

</mosaic_0001>

<bundles_post_ra>
// kernel: tpu_custom_call.1
= control target key start
LH: loop header
LB: loop body
LE: loop exit
PB: predicated region body
PF: predicated region fallthrough
CT: control target
= control target key end

     0   :  { %10 = vsyncpa [#allocation3], 0  ;;  %s333_s0 = inlined_call_operand.hbm [shape: f32[8,128], index: 0, kind: input, shape index: {}]   ;;  %s334_s1 = inlined_call_operand.hbm [shape: f32[128,128], index: 1, kind: input, shape index: {}]   ;;  %s335_s2 = inlined_call_operand.vmem [shape: f32[1,128], index: 2, kind: input, shape index: {}]   ;;  %s336_s3 = inlined_call_operand.hbm [shape: f32[128,128], index: 3, kind: input, shape index: {}]   ;;  %s337_s4 = inlined_call_operand.vmem [shape: f32[1,128], index: 4, kind: input, shape index: {}]   ;;  %s338_s5 = inlined_call_operand.hbm [shape: f32[8,128], index: 5, kind: output, shape index: {}]  }
   0x1   :  { %11 = vsyncpa [#allocation6], 0  ;;  %s28_s20 = sshll.u32 %s334_s1, 4  ;;  %s29_s20 = int_to_ptr.hbm [resolvable:$true] %s28_s20 }
   0x2   :  { %12 = vsyncpa [#allocation4], 0  ;;  %s279_s21 = smov [#allocation5]   ;;  %s18_s25 = sshll.u32 %s333_s0, 4  ;;  %s19_s25 = int_to_ptr.hbm [resolvable:$true] %s18_s25 }
   0x3   :  { %s30_s22 = sshll.u32 %s279_s21, 4  ;;  %s280_s26 = smov 128   ;;  %s31_s22 = int_to_ptr.vmem [resolvable:$true] %s30_s22 }
   0x4   :  { %s281_s27 = smov 8   ;;  %s282_s28 = smov [#allocation2]  }
   0x5   :  { %36 = dma.hbm_to_vmem [thread:$0]  %s29_s20, 2048, %s31_s22, [#allocation6], %s280_s26, %s280_s26, %s281_s27  }
   0x6   :  { %s20_s29 = sshll.u32 %s282_s28, 4  ;;  %s43_s7 = sshll.u32 %s336_s3, 4  ;;  %s21_s29 = int_to_ptr.vmem [resolvable:$true] %s20_s29  ;;  %s44_s7 = int_to_ptr.hbm [resolvable:$true] %s43_s7 }
   0x7   :  { %23 = dma.hbm_to_vmem [thread:$0]  %s19_s25, 128, %s21_s29, [#allocation3]  }
   0x8   :  { %s283_s1 = smov [#allocation7]  }
   0x9   :  { %s45_s8 = sshll.u32 %s283_s1, 4  ;;  %s46_s8 = int_to_ptr.vmem [resolvable:$true] %s45_s8 }
   0xa   :  { %51 = dma.hbm_to_vmem [thread:$0]  %s44_s7, 2048, %s46_s8, [#allocation6], %s280_s26, %s280_s26, %s281_s27  }
   0xb   :  { %273 = dma.done.wait [#allocation3], 128  }
   0xc   :  { %274 = vsyncadd [#allocation3], 4294967168 }
   0xd   :  { %275 = dma.done.wait [#allocation6], 4096  }
   0xe   :  { %276 = vsyncadd [#allocation6], 4294963200  ;;  %v82_v0 = vld [vmem:[#allocation5 + $0x78] sm:$0xff]  ;;  %v81_v1 = vld [vmem:[#allocation5 + $0x70] sm:$0xff]  ;;  %s284_s11 = smov [#allocation8]   ;;  %s156_s15 = sshll.u32 %s338_s5, 4  ;;  %s157_s15 = int_to_ptr.hbm [resolvable:$true] %s156_s15 }
   0xf   :  { %87 = vmatpush.msra.mxu0 %v82_v0  ;;  %v80_v2 = vld [vmem:[#allocation5 + $0x68] sm:$0xff]  ;;  %v79_v3 = vld [vmem:[#allocation5 + $0x60] sm:$0xff]  ;;  %v123_v4 = vld [vmem:[#allocation7 + $0x78] sm:$0xff]  ;;  %s154_s12 = sshll.u32 %s284_s11, 4  ;;  %s155_s12 = int_to_ptr.vmem [resolvable:$true] %s154_s12 }
  0x10   :  { %v78_v5 = vld [vmem:[#allocation5 + $0x58] sm:$0xff]  ;;  %128 = vmatpush.msra.mxu1 %v123_v4  ;;  %v122_v6 = vld [vmem:[#allocation7 + $0x70] sm:$0xff]  ;;  %v121_v7 = vld [vmem:[#allocation7 + $0x68] sm:$0xff] }
  0x11   :  { %88 = vmatpush.msra.mxu0 %v81_v1  ;;  %v77_v8 = vld [vmem:[#allocation5 + $0x50] sm:$0xff]  ;;  %v120_v9 = vld [vmem:[#allocation7 + $0x60] sm:$0xff]  ;;  %v76_v10 = vld [vmem:[#allocation5 + $0x48] sm:$0xff] }
  0x12   :  { %129 = vmatpush.msra.mxu1 %v122_v6  ;;  %v119_v11 = vld [vmem:[#allocation7 + $0x58] sm:$0xff]  ;;  %v75_v12 = vld [vmem:[#allocation5 + $0x40] sm:$0xff]  ;;  %v118_v13 = vld [vmem:[#allocation7 + $0x50] sm:$0xff] }
  0x13   :  { %89 = vmatpush.msra.mxu0 %v80_v2  ;;  %v74_v14 = vld [vmem:[#allocation5 + $0x38] sm:$0xff]  ;;  %v117_v15 = vld [vmem:[#allocation7 + $0x48] sm:$0xff]  ;;  %v73_v16 = vld [vmem:[#allocation5 + $0x30] sm:$0xff] }
  0x14   :  { %130 = vmatpush.msra.mxu1 %v121_v7  ;;  %v116_v17 = vld [vmem:[#allocation7 + $0x40] sm:$0xff]  ;;  %v72_v18 = vld [vmem:[#allocation5 + $0x28] sm:$0xff]  ;;  %v115_v19 = vld [vmem:[#allocation7 + $0x38] sm:$0xff] }
  0x15   :  { %90 = vmatpush.msra.mxu0 %v79_v3  ;;  %v71_v20 = vld [vmem:[#allocation5 + $0x20] sm:$0xff]  ;;  %v114_v21 = vld [vmem:[#allocation7 + $0x30] sm:$0xff]  ;;  %v70_v22 = vld [vmem:[#allocation5 + $0x18] sm:$0xff] }
  0x16   :  { %131 = vmatpush.msra.mxu1 %v120_v9  ;;  %v113_v23 = vld [vmem:[#allocation7 + $0x28] sm:$0xff]  ;;  %v69_v24 = vld [vmem:[#allocation5 + $0x10] sm:$0xff]  ;;  %v67_v26 = vld [vmem:[#allocation5] sm:$0xff] }
  0x17   :  { %91 = vmatpush.msra.mxu0 %v78_v5  ;;  %v68_v25 = vld [vmem:[#allocation5 + $0x8] sm:$0xff]  ;;  %v66_v27 = vld [vmem:[#allocation2] sm:$0xff]  ;;  %v112_v28 = vld [vmem:[#allocation7 + $0x20] sm:$0xff] }
  0x18   :  { %132 = vmatpush.msra.mxu1 %v119_v11  ;;  %v111_v29 = vld [vmem:[#allocation7 + $0x18] sm:$0xff]  ;;  %v110_v30 = vld [vmem:[#allocation7 + $0x10] sm:$0xff]  ;;  %v109_v31 = vld [vmem:[#allocation7 + $0x8] sm:$0xff] }
  0x19   :  { %92 = vmatpush.msra.mxu0 %v77_v8  ;;  %v108_v32 = vld [vmem:[#allocation7] sm:$0xff]  ;;  %v173_v33 = vld [vmem:[%s335_s2] ss:$0 sm:$0xff] }
  0x1a   :  { %133 = vmatpush.msra.mxu1 %v118_v13  ;;  %v174_v37 = vld [vmem:[%s337_s4] ss:$0 sm:$0xff] }
  0x1b   :  { %93 = vmatpush.msra.mxu0 %v76_v10 }
  0x1c   :  { %134 = vmatpush.msra.mxu1 %v117_v15 }
  0x1d   :  { %94 = vmatpush.msra.mxu0 %v75_v12 }
  0x1e   :  { %135 = vmatpush.msra.mxu1 %v116_v17 }
  0x1f   :  { %95 = vmatpush.msra.mxu0 %v74_v14 }
  0x20   :  { %136 = vmatpush.msra.mxu1 %v115_v19 }
  0x21   :  { %96 = vmatpush.msra.mxu0 %v73_v16 }
  0x22   :  { %137 = vmatpush.msra.mxu1 %v114_v21 }
  0x23   :  { %97 = vmatpush.msra.mxu0 %v72_v18 }
  0x24   :  { %138 = vmatpush.msra.mxu1 %v113_v23 }
  0x25   :  { %98 = vmatpush.msra.mxu0 %v71_v20 }
  0x26   :  { %139 = vmatpush.msra.mxu1 %v112_v28 }
  0x27   :  { %99 = vmatpush.msra.mxu0 %v70_v22 }
  0x28   :  { %140 = vmatpush.msra.mxu1 %v111_v29 }
  0x29   :  { %100 = vmatpush.msra.mxu0 %v69_v24 }
  0x2a   :  { %141 = vmatpush.msra.mxu1 %v110_v30 }
  0x2b   :  { %101 = vmatpush.msra.mxu0 %v68_v25 }
  0x2c   :  { %142 = vmatpush.msra.mxu1 %v109_v31 }
  0x2d   :  { %102 = vmatpush.msra.mxu0 %v67_v26 }
  0x2e   :  { %103 = vmatmul.f32.vlgmr.msra.gmra.mxu0 %v66_v27  ;;  %143 = vmatpush.msra.mxu1 %v108_v32 }
  0xab   :  { %v104_v34 = vpop.f32.mrf.mxu0 }
  0xac   :  { %v105_v35 = vadd.f32 %v173_v33, %v104_v34 }
  0xae   :  { %175 = vtanh.f32 %v105_v35 }
  0xb4   :  { %v176_v36 = vpop.eup %175 }
  0xb5   :  { %144 = vmatmul.f32.vlgmr.msra.gmra.mxu1 %v176_v36 }
 0x132   :  { %v145_v38 = vpop.f32.mrf.mxu1 }
 0x133   :  { %v146_v39 = vadd.f32 %v174_v37, %v145_v38 }
 0x135   :  { %148 = vst [vmem:[#allocation8] sm:$0xff] %v146_v39 }
 0x136   :  { %159 = dma.vmem_to_hbm [thread:$0]  %s155_s12, 128, %s157_s15, [#allocation4]  }
 0x137   :  { %277 = dma.done.wait [#allocation4], 128  }
 0x138   :  { %278 = vsyncadd [#allocation4], 4294967168 }
 0x139   :  { %164 = vsyncpa [#allocation3], 1 }
 0x13a   :  { %165 = vsyncpa [#allocation6], 1 }
 0x13b   :  { %166 = vsyncpa [#allocation4], 1 }

</bundles_post_ra>
